<compile_context>
chip_gen: v7x
topology: tpu7x:2x2x1
jax: 0.10.0
libtpu: 0.0.40
codegen_flags: <defaults>
</compile_context>

<pallas_src>
import functools

import jax
import jax.numpy as jnp
from jax.experimental import pallas as pl
from jax.experimental.pallas import tpu as pltpu


def _lstm_linear_kernel(emb_ref, wih_t_ref, whh_t_ref, b_ref,
                        wlin_t_ref, blin_ref, out_ref, xw_sc, h_all_sc):
    """Whole forward in one invocation.

    emb_ref   : (S, Bp, E)   embedded inputs (batch padded to Bp)
    wih_t_ref : (E, 4H)      pre-transposed input-hidden weights (gate order i,f,g,o)
    whh_t_ref : (H, 4H)      pre-transposed hidden-hidden weights
    b_ref     : (1, 4H)      pre-summed bias (b_ih + b_hh)
    wlin_t_ref: (H, C)       pre-transposed final linear weight
    blin_ref  : (1, C)       final linear bias
    out_ref   : (S, Bp, C)   logits
    xw_sc     : (S, Bp, 4H)  VMEM scratch: hoisted input projection
    h_all_sc  : (S, Bp, H)   VMEM scratch: hidden-state history
    """
    S, Bp, E = emb_ref.shape
    H = whh_t_ref.shape[0]
    C = wlin_t_ref.shape[1]

    # (1) Batched input projection for all time steps at once (hoisted out of
    #     the serial recurrence): (S*Bp, E) @ (E, 4H) + (b_ih + b_hh).
    x_all = emb_ref[...].reshape(S * Bp, E)
    xw = (jnp.dot(x_all, wih_t_ref[...], preferred_element_type=jnp.float32)
          + b_ref[...])
    xw_sc[...] = xw.reshape(S, Bp, 4 * H)

    whh_t = whh_t_ref[...]  # loop-invariant, load once

    # (2) Serial recurrence: only h_{t-1} @ W_hh_T stays inside the loop.
    def step(t, carry):
        h_prev, c_prev = carry
        gates = xw_sc[t] + jnp.dot(h_prev, whh_t,
                                   preferred_element_type=jnp.float32)  # (Bp, 4H)
        # Activate the full (Bp, 4H=128) block once, then take lane slices.
        sig = jax.nn.sigmoid(gates)
        tnh = jnp.tanh(gates)
        i_g = sig[:, 0 * H:1 * H]
        f_g = sig[:, 1 * H:2 * H]
        g_g = tnh[:, 2 * H:3 * H]
        o_g = sig[:, 3 * H:4 * H]
        c_new = f_g * c_prev + i_g * g_g
        h_new = o_g * jnp.tanh(c_new)
        h_all_sc[t] = h_new
        return (h_new, c_new)

    init = (jnp.zeros((Bp, H), jnp.float32), jnp.zeros((Bp, H), jnp.float32))
    jax.lax.fori_loop(0, S, step, init, unroll=True)

    # (3) Deferred final Linear over all (S*Bp) hidden states in one matmul,
    #     single writeback of the whole output block.
    h_flat = h_all_sc[...].reshape(S * Bp, H)
    logits = (jnp.dot(h_flat, wlin_t_ref[...], preferred_element_type=jnp.float32)
              + blin_ref[...])
    out_ref[...] = logits.reshape(S, Bp, C).astype(out_ref.dtype)


@functools.partial(jax.jit, static_argnames=())
def term_identification_forward(token_ids, params):
    """token_ids: (S, B) int32. Returns logits (S, B, C) float32."""
    emb_table = params["embedding"]                       # (V, E)
    # Pre-transpose weights / pre-sum biases once in the wrapper (loop-invariant).
    w_ih_t = params["w_ih"].T                             # (E, 4H)
    w_hh_t = params["w_hh"].T                             # (H, 4H)
    b = (params["b_ih"] + params["b_hh"]).reshape(1, -1)  # (1, 4H)
    w_lin_t = params["w_lin"].T                           # (H, C)
    b_lin = params["b_lin"].reshape(1, -1)                # (1, C)

    # Embedding lookup (glue, plain JAX gather).
    # TODO(synk): could move the gather in-kernel via scalar prefetch of ids.
    emb = emb_table[token_ids]                            # (S, B, E)
    S, B, E = emb.shape
    H = w_hh_t.shape[0]
    C = w_lin_t.shape[1]

    # Pad batch to a multiple of 8 sublanes (f32) so vregs are fully populated.
    Bp = max(8, -(-B // 8) * 8)
    if Bp != B:
        emb = jnp.pad(emb, ((0, 0), (0, Bp - B), (0, 0)))

    out = pl.pallas_call(
        _lstm_linear_kernel,
        out_shape=jax.ShapeDtypeStruct((S, Bp, C), jnp.float32),
        in_specs=[pl.BlockSpec(memory_space=pltpu.MemorySpace.VMEM)] * 6,
        out_specs=pl.BlockSpec(memory_space=pltpu.MemorySpace.VMEM),
        scratch_shapes=[
            pltpu.VMEM((S, Bp, 4 * H), jnp.float32),   # hoisted input projection
            pltpu.VMEM((S, Bp, H), jnp.float32),       # hidden-state history
        ],
    )(emb, w_ih_t, w_hh_t, b, w_lin_t, b_lin)
    return out[:, :B, :]


def init_params(key, vocab_size, embedding_dim, hidden_dim, num_classes):
    """Deterministic synthetic parameter init (PyTorch-like uniform ranges)."""
    k = jax.random.split(key, 7)
    bound = 1.0 / jnp.sqrt(hidden_dim)
    return {
        "embedding": jax.random.normal(k[0], (vocab_size, embedding_dim), jnp.float32),
        "w_ih": jax.random.uniform(k[1], (4 * hidden_dim, embedding_dim),
                                   jnp.float32, -bound, bound),
        "w_hh": jax.random.uniform(k[2], (4 * hidden_dim, hidden_dim),
                                   jnp.float32, -bound, bound),
        "b_ih": jax.random.uniform(k[3], (4 * hidden_dim,), jnp.float32, -bound, bound),
        "b_hh": jax.random.uniform(k[4], (4 * hidden_dim,), jnp.float32, -bound, bound),
        "w_lin": jax.random.uniform(k[5], (num_classes, hidden_dim),
                                    jnp.float32, -bound, bound),
        "b_lin": jax.random.uniform(k[6], (num_classes,), jnp.float32, -bound, bound),
    }


def _reference_forward(token_ids, params):
    """Pure-JAX reference (mirrors PyTorch semantics) for a correctness check."""
    emb = params["embedding"][token_ids]               # (S, B, E)
    S, B, _ = emb.shape
    H = params["w_hh"].shape[1]
    h = jnp.zeros((B, H), jnp.float32)
    c = jnp.zeros((B, H), jnp.float32)

    def step(carry, x_t):
        h, c = carry
        gates = (x_t @ params["w_ih"].T + params["b_ih"]
                 + h @ params["w_hh"].T + params["b_hh"])
        i = jax.nn.sigmoid(gates[:, 0 * H:1 * H])
        f = jax.nn.sigmoid(gates[:, 1 * H:2 * H])
        g = jnp.tanh(gates[:, 2 * H:3 * H])
        o = jax.nn.sigmoid(gates[:, 3 * H:4 * H])
        c = f * c + i * g
        h = o * jnp.tanh(c)
        return (h, c), h

    _, hs = jax.lax.scan(step, (h, c), emb)            # (S, B, H)
    return hs @ params["w_lin"].T + params["b_lin"]    # (S, B, C)


if __name__ == "__main__":
    # hparams: embedding_dim=32, lstm_hidden_dim=32, num_classes=8
    VOCAB, EMB, HID, CLS = 64, 32, 32, 8
    SEQ, BATCH = 8, 4

    key = jax.random.PRNGKey(0)
    pkey, xkey = jax.random.split(key)
    params = init_params(pkey, VOCAB, EMB, HID, CLS)
    token_ids = jax.random.randint(xkey, (SEQ, BATCH), 0, VOCAB, dtype=jnp.int32)

    out = term_identification_forward(token_ids, params)
    out = jax.block_until_ready(out)

    ref = _reference_forward(token_ids, params)
    assert out.shape == (SEQ, BATCH, CLS), out.shape
    assert jnp.allclose(out, ref, atol=1e-5, rtol=1e-5), float(jnp.max(jnp.abs(out - ref)))

    print("KERNEL_OK")
</pallas_src>

<mosaic_0001>
module attributes {stable_mosaic.version = 11 : i64} {
  func.func @_lstm_linear_kernel(%arg0: memref<8x8x32xf32, #tpu.memory_space<vmem>>, %arg1: memref<32x128xf32, #tpu.memory_space<vmem>>, %arg2: memref<32x128xf32, #tpu.memory_space<vmem>>, %arg3: memref<1x128xf32, #tpu.memory_space<vmem>>, %arg4: memref<32x8xf32, #tpu.memory_space<vmem>>, %arg5: memref<1x8xf32, #tpu.memory_space<vmem>>, %arg6: memref<8x8x8xf32, #tpu.memory_space<vmem>>, %arg7: memref<8x8x128xf32, #tpu.memory_space<vmem>>, %arg8: memref<8x8x32xf32, #tpu.memory_space<vmem>>) attributes {dimension_semantics = [], scalar_prefetch = 0 : i64, scratch_operands = 2 : i64, tpu.core_type = #tpu.core_type<tc>} {
    %c0 = arith.constant 0 : index
    %c0_0 = arith.constant 0 : index
    %c0_1 = arith.constant 0 : index
    %0 = vector.load %arg0[%c0, %c0_0, %c0_1] : memref<8x8x32xf32, #tpu.memory_space<vmem>>, vector<8x8x32xf32>
    %1 = vector.shape_cast %0 : vector<8x8x32xf32> to vector<64x32xf32>
    %c0_2 = arith.constant 0 : index
    %c0_3 = arith.constant 0 : index
    %2 = vector.load %arg1[%c0_2, %c0_3] : memref<32x128xf32, #tpu.memory_space<vmem>>, vector<32x128xf32>
    %cst = arith.constant dense<0.000000e+00> : vector<64x128xf32>
    %3 = tpu.matmul %1, %2, %cst {dimension_numbers = #tpu.dot_dimension_numbers<[1], [0], [0], [1], [0, 0, 1, 1], [], []>} : vector<64x32xf32>, vector<32x128xf32>, vector<64x128xf32> -> vector<64x128xf32>
    %c0_4 = arith.constant 0 : index
    %c0_5 = arith.constant 0 : index
    %4 = vector.load %arg3[%c0_4, %c0_5] : memref<1x128xf32, #tpu.memory_space<vmem>>, vector<1x128xf32>
    %5 = vector.broadcast %4 : vector<1x128xf32> to vector<64x128xf32>
    %6 = arith.addf %3, %5 : vector<64x128xf32>
    %7 = vector.shape_cast %6 : vector<64x128xf32> to vector<8x8x128xf32>
    %c0_6 = arith.constant 0 : index
    %c0_7 = arith.constant 0 : index
    %c0_8 = arith.constant 0 : index
    %8 = vector.load %arg7[%c0_6, %c0_7, %c0_8] : memref<8x8x128xf32, #tpu.memory_space<vmem>>, vector<8x8x128xf32>
    tpu.vector_store %arg7[%c0_6, %c0_7, %c0_8], %7 {strides = array<i32>} : memref<8x8x128xf32, #tpu.memory_space<vmem>>, vector<8x8x128xf32>,
    %c0_9 = arith.constant 0 : index
    %c0_10 = arith.constant 0 : index
    %9 = vector.load %arg2[%c0_9, %c0_10] : memref<32x128xf32, #tpu.memory_space<vmem>>, vector<32x128xf32>
    %cst_11 = arith.constant 0.000000e+00 : f32
    %10 = vector.broadcast %cst_11 : f32 to vector<8x32xf32>
    %cst_12 = arith.constant 0.000000e+00 : f32
    %11 = vector.broadcast %cst_12 : f32 to vector<8x32xf32>
    %c0_i32 = arith.constant 0 : i32
    %12 = arith.index_cast %c0_i32 : i32 to index
    %c0_13 = arith.constant 0 : index
    %c0_14 = arith.constant 0 : index
    %13 = vector.load %arg7[%12, %c0_13, %c0_14] : memref<8x8x128xf32, #tpu.memory_space<vmem>>, vector<1x8x128xf32>
    %14 = vector.shape_cast %13 : vector<1x8x128xf32> to vector<8x128xf32>
    %cst_15 = arith.constant dense<0.000000e+00> : vector<8x128xf32>
    %15 = tpu.matmul %10, %9, %cst_15 {dimension_numbers = #tpu.dot_dimension_numbers<[1], [0], [0], [1], [0, 0, 1, 1], [], []>} : vector<8x32xf32>, vector<32x128xf32>, vector<8x128xf32> -> vector<8x128xf32>
    %16 = arith.addf %14, %15 : vector<8x128xf32>
    %17 = arith.negf %16 : vector<8x128xf32>
    %18 = math.exp %17 : vector<8x128xf32>
    %cst_16 = arith.constant 1.000000e+00 : f32
    %19 = vector.broadcast %cst_16 : f32 to vector<8x128xf32>
    %20 = arith.addf %19, %18 : vector<8x128xf32>
    %21 = arith.divf %19, %20 : vector<8x128xf32>
    %22 = math.tanh %16 : vector<8x128xf32>
    %23 = vector.extract_strided_slice %21 {offsets = [0, 0], sizes = [8, 32], strides = [1, 1]} : vector<8x128xf32> to vector<8x32xf32>
    %24 = vector.extract_strided_slice %21 {offsets = [0, 32], sizes = [8, 32], strides = [1, 1]} : vector<8x128xf32> to vector<8x32xf32>
    %25 = vector.extract_strided_slice %22 {offsets = [0, 64], sizes = [8, 32], strides = [1, 1]} : vector<8x128xf32> to vector<8x32xf32>
    %26 = vector.extract_strided_slice %21 {offsets = [0, 96], sizes = [8, 32], strides = [1, 1]} : vector<8x128xf32> to vector<8x32xf32>
    %27 = arith.mulf %24, %11 : vector<8x32xf32>
    %28 = arith.mulf %23, %25 : vector<8x32xf32>
    %29 = arith.addf %27, %28 : vector<8x32xf32>
    %30 = math.tanh %29 : vector<8x32xf32>
    %31 = arith.mulf %26, %30 : vector<8x32xf32>
    %32 = arith.index_cast %c0_i32 : i32 to index
    %c0_17 = arith.constant 0 : index
    %c0_18 = arith.constant 0 : index
    %33 = vector.load %arg8[%32, %c0_17, %c0_18] : memref<8x8x32xf32, #tpu.memory_space<vmem>>, vector<1x8x32xf32>
    %34 = vector.shape_cast %33 : vector<1x8x32xf32> to vector<8x32xf32>
    %35 = vector.shape_cast %31 : vector<8x32xf32> to vector<1x8x32xf32>
    tpu.vector_store %arg8[%32, %c0_17, %c0_18], %35 {strides = array<i32>} : memref<8x8x32xf32, #tpu.memory_space<vmem>>, vector<1x8x32xf32>,
    %c1_i32 = arith.constant 1 : i32
    %36 = arith.index_cast %c1_i32 : i32 to index
    %c0_19 = arith.constant 0 : index
    %c0_20 = arith.constant 0 : index
    %37 = vector.load %arg7[%36, %c0_19, %c0_20] : memref<8x8x128xf32, #tpu.memory_space<vmem>>, vector<1x8x128xf32>
    %38 = vector.shape_cast %37 : vector<1x8x128xf32> to vector<8x128xf32>
    %cst_21 = arith.constant dense<0.000000e+00> : vector<8x128xf32>
    %39 = tpu.matmul %31, %9, %cst_21 {dimension_numbers = #tpu.dot_dimension_numbers<[1], [0], [0], [1], [0, 0, 1, 1], [], []>} : vector<8x32xf32>, vector<32x128xf32>, vector<8x128xf32> -> vector<8x128xf32>
    %40 = arith.addf %38, %39 : vector<8x128xf32>
    %41 = arith.negf %40 : vector<8x128xf32>
    %42 = math.exp %41 : vector<8x128xf32>
    %cst_22 = arith.constant 1.000000e+00 : f32
    %43 = vector.broadcast %cst_22 : f32 to vector<8x128xf32>
    %44 = arith.addf %43, %42 : vector<8x128xf32>
    %45 = arith.divf %43, %44 : vector<8x128xf32>
    %46 = math.tanh %40 : vector<8x128xf32>
    %47 = vector.extract_strided_slice %45 {offsets = [0, 0], sizes = [8, 32], strides = [1, 1]} : vector<8x128xf32> to vector<8x32xf32>
    %48 = vector.extract_strided_slice %45 {offsets = [0, 32], sizes = [8, 32], strides = [1, 1]} : vector<8x128xf32> to vector<8x32xf32>
    %49 = vector.extract_strided_slice %46 {offsets = [0, 64], sizes = [8, 32], strides = [1, 1]} : vector<8x128xf32> to vector<8x32xf32>
    %50 = vector.extract_strided_slice %45 {offsets = [0, 96], sizes = [8, 32], strides = [1, 1]} : vector<8x128xf32> to vector<8x32xf32>
    %51 = arith.mulf %48, %29 : vector<8x32xf32>
    %52 = arith.mulf %47, %49 : vector<8x32xf32>
    %53 = arith.addf %51, %52 : vector<8x32xf32>
    %54 = math.tanh %53 : vector<8x32xf32>
    %55 = arith.mulf %50, %54 : vector<8x32xf32>
    %56 = arith.index_cast %c1_i32 : i32 to index
    %c0_23 = arith.constant 0 : index
    %c0_24 = arith.constant 0 : index
    %57 = vector.load %arg8[%56, %c0_23, %c0_24] : memref<8x8x32xf32, #tpu.memory_space<vmem>>, vector<1x8x32xf32>
    %58 = vector.shape_cast %57 : vector<1x8x32xf32> to vector<8x32xf32>
    %59 = vector.shape_cast %55 : vector<8x32xf32> to vector<1x8x32xf32>
    tpu.vector_store %arg8[%56, %c0_23, %c0_24], %59 {strides = array<i32>} : memref<8x8x32xf32, #tpu.memory_space<vmem>>, vector<1x8x32xf32>,
    %c2_i32 = arith.constant 2 : i32
    %60 = arith.index_cast %c2_i32 : i32 to index
    %c0_25 = arith.constant 0 : index
    %c0_26 = arith.constant 0 : index
    %61 = vector.load %arg7[%60, %c0_25, %c0_26] : memref<8x8x128xf32, #tpu.memory_space<vmem>>, vector<1x8x128xf32>
    %62 = vector.shape_cast %61 : vector<1x8x128xf32> to vector<8x128xf32>
    %cst_27 = arith.constant dense<0.000000e+00> : vector<8x128xf32>
    %63 = tpu.matmul %55, %9, %cst_27 {dimension_numbers = #tpu.dot_dimension_numbers<[1], [0], [0], [1], [0, 0, 1, 1], [], []>} : vector<8x32xf32>, vector<32x128xf32>, vector<8x128xf32> -> vector<8x128xf32>
    %64 = arith.addf %62, %63 : vector<8x128xf32>
    %65 = arith.negf %64 : vector<8x128xf32>
    %66 = math.exp %65 : vector<8x128xf32>
    %cst_28 = arith.constant 1.000000e+00 : f32
    %67 = vector.broadcast %cst_28 : f32 to vector<8x128xf32>
    %68 = arith.addf %67, %66 : vector<8x128xf32>
    %69 = arith.divf %67, %68 : vector<8x128xf32>
    %70 = math.tanh %64 : vector<8x128xf32>
    %71 = vector.extract_strided_slice %69 {offsets = [0, 0], sizes = [8, 32], strides = [1, 1]} : vector<8x128xf32> to vector<8x32xf32>
    %72 = vector.extract_strided_slice %69 {offsets = [0, 32], sizes = [8, 32], strides = [1, 1]} : vector<8x128xf32> to vector<8x32xf32>
    %73 = vector.extract_strided_slice %70 {offsets = [0, 64], sizes = [8, 32], strides = [1, 1]} : vector<8x128xf32> to vector<8x32xf32>
    %74 = vector.extract_strided_slice %69 {offsets = [0, 96], sizes = [8, 32], strides = [1, 1]} : vector<8x128xf32> to vector<8x32xf32>
    %75 = arith.mulf %72, %53 : vector<8x32xf32>
    %76 = arith.mulf %71, %73 : vector<8x32xf32>
    %77 = arith.addf %75, %76 : vector<8x32xf32>
    %78 = math.tanh %77 : vector<8x32xf32>
    %79 = arith.mulf %74, %78 : vector<8x32xf32>
    %80 = arith.index_cast %c2_i32 : i32 to index
    %c0_29 = arith.constant 0 : index
    %c0_30 = arith.constant 0 : index
    %81 = vector.load %arg8[%80, %c0_29, %c0_30] : memref<8x8x32xf32, #tpu.memory_space<vmem>>, vector<1x8x32xf32>
    %82 = vector.shape_cast %81 : vector<1x8x32xf32> to vector<8x32xf32>
    %83 = vector.shape_cast %79 : vector<8x32xf32> to vector<1x8x32xf32>
    tpu.vector_store %arg8[%80, %c0_29, %c0_30], %83 {strides = array<i32>} : memref<8x8x32xf32, #tpu.memory_space<vmem>>, vector<1x8x32xf32>,
    %c3_i32 = arith.constant 3 : i32
    %84 = arith.index_cast %c3_i32 : i32 to index
    %c0_31 = arith.constant 0 : index
    %c0_32 = arith.constant 0 : index
    %85 = vector.load %arg7[%84, %c0_31, %c0_32] : memref<8x8x128xf32, #tpu.memory_space<vmem>>, vector<1x8x128xf32>
    %86 = vector.shape_cast %85 : vector<1x8x128xf32> to vector<8x128xf32>
    %cst_33 = arith.constant dense<0.000000e+00> : vector<8x128xf32>
    %87 = tpu.matmul %79, %9, %cst_33 {dimension_numbers = #tpu.dot_dimension_numbers<[1], [0], [0], [1], [0, 0, 1, 1], [], []>} : vector<8x32xf32>, vector<32x128xf32>, vector<8x128xf32> -> vector<8x128xf32>
    %88 = arith.addf %86, %87 : vector<8x128xf32>
    %89 = arith.negf %88 : vector<8x128xf32>
    %90 = math.exp %89 : vector<8x128xf32>
    %cst_34 = arith.constant 1.000000e+00 : f32
    %91 = vector.broadcast %cst_34 : f32 to vector<8x128xf32>
    %92 = arith.addf %91, %90 : vector<8x128xf32>
    %93 = arith.divf %91, %92 : vector<8x128xf32>
    %94 = math.tanh %88 : vector<8x128xf32>
    %95 = vector.extract_strided_slice %93 {offsets = [0, 0], sizes = [8, 32], strides = [1, 1]} : vector<8x128xf32> to vector<8x32xf32>
    %96 = vector.extract_strided_slice %93 {offsets = [0, 32], sizes = [8, 32], strides = [1, 1]} : vector<8x128xf32> to vector<8x32xf32>
    %97 = vector.extract_strided_slice %94 {offsets = [0, 64], sizes = [8, 32], strides = [1, 1]} : vector<8x128xf32> to vector<8x32xf32>
    %98 = vector.extract_strided_slice %93 {offsets = [0, 96], sizes = [8, 32], strides = [1, 1]} : vector<8x128xf32> to vector<8x32xf32>
    %99 = arith.mulf %96, %77 : vector<8x32xf32>
    %100 = arith.mulf %95, %97 : vector<8x32xf32>
    %101 = arith.addf %99, %100 : vector<8x32xf32>
    %102 = math.tanh %101 : vector<8x32xf32>
    %103 = arith.mulf %98, %102 : vector<8x32xf32>
    %104 = arith.index_cast %c3_i32 : i32 to index
    %c0_35 = arith.constant 0 : index
    %c0_36 = arith.constant 0 : index
    %105 = vector.load %arg8[%104, %c0_35, %c0_36] : memref<8x8x32xf32, #tpu.memory_space<vmem>>, vector<1x8x32xf32>
    %106 = vector.shape_cast %105 : vector<1x8x32xf32> to vector<8x32xf32>
    %107 = vector.shape_cast %103 : vector<8x32xf32> to vector<1x8x32xf32>
    tpu.vector_store %arg8[%104, %c0_35, %c0_36], %107 {strides = array<i32>} : memref<8x8x32xf32, #tpu.memory_space<vmem>>, vector<1x8x32xf32>,
    %c4_i32 = arith.constant 4 : i32
    %108 = arith.index_cast %c4_i32 : i32 to index
    %c0_37 = arith.constant 0 : index
    %c0_38 = arith.constant 0 : index
    %109 = vector.load %arg7[%108, %c0_37, %c0_38] : memref<8x8x128xf32, #tpu.memory_space<vmem>>, vector<1x8x128xf32>
    %110 = vector.shape_cast %109 : vector<1x8x128xf32> to vector<8x128xf32>
    %cst_39 = arith.constant dense<0.000000e+00> : vector<8x128xf32>
    %111 = tpu.matmul %103, %9, %cst_39 {dimension_numbers = #tpu.dot_dimension_numbers<[1], [0], [0], [1], [0, 0, 1, 1], [], []>} : vector<8x32xf32>, vector<32x128xf32>, vector<8x128xf32> -> vector<8x128xf32>
    %112 = arith.addf %110, %111 : vector<8x128xf32>
    %113 = arith.negf %112 : vector<8x128xf32>
    %114 = math.exp %113 : vector<8x128xf32>
    %cst_40 = arith.constant 1.000000e+00 : f32
    %115 = vector.broadcast %cst_40 : f32 to vector<8x128xf32>
    %116 = arith.addf %115, %114 : vector<8x128xf32>
    %117 = arith.divf %115, %116 : vector<8x128xf32>
    %118 = math.tanh %112 : vector<8x128xf32>
    %119 = vector.extract_strided_slice %117 {offsets = [0, 0], sizes = [8, 32], strides = [1, 1]} : vector<8x128xf32> to vector<8x32xf32>
    %120 = vector.extract_strided_slice %117 {offsets = [0, 32], sizes = [8, 32], strides = [1, 1]} : vector<8x128xf32> to vector<8x32xf32>
    %121 = vector.extract_strided_slice %118 {offsets = [0, 64], sizes = [8, 32], strides = [1, 1]} : vector<8x128xf32> to vector<8x32xf32>
    %122 = vector.extract_strided_slice %117 {offsets = [0, 96], sizes = [8, 32], strides = [1, 1]} : vector<8x128xf32> to vector<8x32xf32>
    %123 = arith.mulf %120, %101 : vector<8x32xf32>
    %124 = arith.mulf %119, %121 : vector<8x32xf32>
    %125 = arith.addf %123, %124 : vector<8x32xf32>
    %126 = math.tanh %125 : vector<8x32xf32>
    %127 = arith.mulf %122, %126 : vector<8x32xf32>
    %128 = arith.index_cast %c4_i32 : i32 to index
    %c0_41 = arith.constant 0 : index
    %c0_42 = arith.constant 0 : index
    %129 = vector.load %arg8[%128, %c0_41, %c0_42] : memref<8x8x32xf32, #tpu.memory_space<vmem>>, vector<1x8x32xf32>
    %130 = vector.shape_cast %129 : vector<1x8x32xf32> to vector<8x32xf32>
    %131 = vector.shape_cast %127 : vector<8x32xf32> to vector<1x8x32xf32>
    tpu.vector_store %arg8[%128, %c0_41, %c0_42], %131 {strides = array<i32>} : memref<8x8x32xf32, #tpu.memory_space<vmem>>, vector<1x8x32xf32>,
    %c5_i32 = arith.constant 5 : i32
    %132 = arith.index_cast %c5_i32 : i32 to index
    %c0_43 = arith.constant 0 : index
    %c0_44 = arith.constant 0 : index
    %133 = vector.load %arg7[%132, %c0_43, %c0_44] : memref<8x8x128xf32, #tpu.memory_space<vmem>>, vector<1x8x128xf32>
    %134 = vector.shape_cast %133 : vector<1x8x128xf32> to vector<8x128xf32>
    %cst_45 = arith.constant dense<0.000000e+00> : vector<8x128xf32>
    %135 = tpu.matmul %127, %9, %cst_45 {dimension_numbers = #tpu.dot_dimension_numbers<[1], [0], [0], [1], [0, 0, 1, 1], [], []>} : vector<8x32xf32>, vector<32x128xf32>, vector<8x128xf32> -> vector<8x128xf32>
    %136 = arith.addf %134, %135 : vector<8x128xf32>
    %137 = arith.negf %136 : vector<8x128xf32>
    %138 = math.exp %137 : vector<8x128xf32>
    %cst_46 = arith.constant 1.000000e+00 : f32
    %139 = vector.broadcast %cst_46 : f32 to vector<8x128xf32>
    %140 = arith.addf %139, %138 : vector<8x128xf32>
    %141 = arith.divf %139, %140 : vector<8x128xf32>
    %142 = math.tanh %136 : vector<8x128xf32>
    %143 = vector.extract_strided_slice %141 {offsets = [0, 0], sizes = [8, 32], strides = [1, 1]} : vector<8x128xf32> to vector<8x32xf32>
    %144 = vector.extract_strided_slice %141 {offsets = [0, 32], sizes = [8, 32], strides = [1, 1]} : vector<8x128xf32> to vector<8x32xf32>
    %145 = vector.extract_strided_slice %142 {offsets = [0, 64], sizes = [8, 32], strides = [1, 1]} : vector<8x128xf32> to vector<8x32xf32>
    %146 = vector.extract_strided_slice %141 {offsets = [0, 96], sizes = [8, 32], strides = [1, 1]} : vector<8x128xf32> to vector<8x32xf32>
    %147 = arith.mulf %144, %125 : vector<8x32xf32>
    %148 = arith.mulf %143, %145 : vector<8x32xf32>
    %149 = arith.addf %147, %148 : vector<8x32xf32>
    %150 = math.tanh %149 : vector<8x32xf32>
    %151 = arith.mulf %146, %150 : vector<8x32xf32>
    %152 = arith.index_cast %c5_i32 : i32 to index
    %c0_47 = arith.constant 0 : index
    %c0_48 = arith.constant 0 : index
    %153 = vector.load %arg8[%152, %c0_47, %c0_48] : memref<8x8x32xf32, #tpu.memory_space<vmem>>, vector<1x8x32xf32>
    %154 = vector.shape_cast %153 : vector<1x8x32xf32> to vector<8x32xf32>
    %155 = vector.shape_cast %151 : vector<8x32xf32> to vector<1x8x32xf32>
    tpu.vector_store %arg8[%152, %c0_47, %c0_48], %155 {strides = array<i32>} : memref<8x8x32xf32, #tpu.memory_space<vmem>>, vector<1x8x32xf32>,
    %c6_i32 = arith.constant 6 : i32
    %156 = arith.index_cast %c6_i32 : i32 to index
    %c0_49 = arith.constant 0 : index
    %c0_50 = arith.constant 0 : index
    %157 = vector.load %arg7[%156, %c0_49, %c0_50] : memref<8x8x128xf32, #tpu.memory_space<vmem>>, vector<1x8x128xf32>
    %158 = vector.shape_cast %157 : vector<1x8x128xf32> to vector<8x128xf32>
    %cst_51 = arith.constant dense<0.000000e+00> : vector<8x128xf32>
    %159 = tpu.matmul %151, %9, %cst_51 {dimension_numbers = #tpu.dot_dimension_numbers<[1], [0], [0], [1], [0, 0, 1, 1], [], []>} : vector<8x32xf32>, vector<32x128xf32>, vector<8x128xf32> -> vector<8x128xf32>
    %160 = arith.addf %158, %159 : vector<8x128xf32>
    %161 = arith.negf %160 : vector<8x128xf32>
    %162 = math.exp %161 : vector<8x128xf32>
    %cst_52 = arith.constant 1.000000e+00 : f32
    %163 = vector.broadcast %cst_52 : f32 to vector<8x128xf32>
    %164 = arith.addf %163, %162 : vector<8x128xf32>
    %165 = arith.divf %163, %164 : vector<8x128xf32>
    %166 = math.tanh %160 : vector<8x128xf32>
    %167 = vector.extract_strided_slice %165 {offsets = [0, 0], sizes = [8, 32], strides = [1, 1]} : vector<8x128xf32> to vector<8x32xf32>
    %168 = vector.extract_strided_slice %165 {offsets = [0, 32], sizes = [8, 32], strides = [1, 1]} : vector<8x128xf32> to vector<8x32xf32>
    %169 = vector.extract_strided_slice %166 {offsets = [0, 64], sizes = [8, 32], strides = [1, 1]} : vector<8x128xf32> to vector<8x32xf32>
    %170 = vector.extract_strided_slice %165 {offsets = [0, 96], sizes = [8, 32], strides = [1, 1]} : vector<8x128xf32> to vector<8x32xf32>
    %171 = arith.mulf %168, %149 : vector<8x32xf32>
    %172 = arith.mulf %167, %169 : vector<8x32xf32>
    %173 = arith.addf %171, %172 : vector<8x32xf32>
    %174 = math.tanh %173 : vector<8x32xf32>
    %175 = arith.mulf %170, %174 : vector<8x32xf32>
    %176 = arith.index_cast %c6_i32 : i32 to index
    %c0_53 = arith.constant 0 : index
    %c0_54 = arith.constant 0 : index
    %177 = vector.load %arg8[%176, %c0_53, %c0_54] : memref<8x8x32xf32, #tpu.memory_space<vmem>>, vector<1x8x32xf32>
    %178 = vector.shape_cast %177 : vector<1x8x32xf32> to vector<8x32xf32>
    %179 = vector.shape_cast %175 : vector<8x32xf32> to vector<1x8x32xf32>
    tpu.vector_store %arg8[%176, %c0_53, %c0_54], %179 {strides = array<i32>} : memref<8x8x32xf32, #tpu.memory_space<vmem>>, vector<1x8x32xf32>,
    %c7_i32 = arith.constant 7 : i32
    %180 = arith.index_cast %c7_i32 : i32 to index
    %c0_55 = arith.constant 0 : index
    %c0_56 = arith.constant 0 : index
    %181 = vector.load %arg7[%180, %c0_55, %c0_56] : memref<8x8x128xf32, #tpu.memory_space<vmem>>, vector<1x8x128xf32>
    %182 = vector.shape_cast %181 : vector<1x8x128xf32> to vector<8x128xf32>
    %cst_57 = arith.constant dense<0.000000e+00> : vector<8x128xf32>
    %183 = tpu.matmul %175, %9, %cst_57 {dimension_numbers = #tpu.dot_dimension_numbers<[1], [0], [0], [1], [0, 0, 1, 1], [], []>} : vector<8x32xf32>, vector<32x128xf32>, vector<8x128xf32> -> vector<8x128xf32>
    %184 = arith.addf %182, %183 : vector<8x128xf32>
    %185 = arith.negf %184 : vector<8x128xf32>
    %186 = math.exp %185 : vector<8x128xf32>
    %cst_58 = arith.constant 1.000000e+00 : f32
    %187 = vector.broadcast %cst_58 : f32 to vector<8x128xf32>
    %188 = arith.addf %187, %186 : vector<8x128xf32>
    %189 = arith.divf %187, %188 : vector<8x128xf32>
    %190 = math.tanh %184 : vector<8x128xf32>
    %191 = vector.extract_strided_slice %189 {offsets = [0, 0], sizes = [8, 32], strides = [1, 1]} : vector<8x128xf32> to vector<8x32xf32>
    %192 = vector.extract_strided_slice %189 {offsets = [0, 32], sizes = [8, 32], strides = [1, 1]} : vector<8x128xf32> to vector<8x32xf32>
    %193 = vector.extract_strided_slice %190 {offsets = [0, 64], sizes = [8, 32], strides = [1, 1]} : vector<8x128xf32> to vector<8x32xf32>
    %194 = vector.extract_strided_slice %189 {offsets = [0, 96], sizes = [8, 32], strides = [1, 1]} : vector<8x128xf32> to vector<8x32xf32>
    %195 = arith.mulf %192, %173 : vector<8x32xf32>
    %196 = arith.mulf %191, %193 : vector<8x32xf32>
    %197 = arith.addf %195, %196 : vector<8x32xf32>
    %198 = math.tanh %197 : vector<8x32xf32>
    %199 = arith.mulf %194, %198 : vector<8x32xf32>
    %200 = arith.index_cast %c7_i32 : i32 to index
    %c0_59 = arith.constant 0 : index
    %c0_60 = arith.constant 0 : index
    %201 = vector.load %arg8[%200, %c0_59, %c0_60] : memref<8x8x32xf32, #tpu.memory_space<vmem>>, vector<1x8x32xf32>
    %202 = vector.shape_cast %201 : vector<1x8x32xf32> to vector<8x32xf32>
    %203 = vector.shape_cast %199 : vector<8x32xf32> to vector<1x8x32xf32>
    tpu.vector_store %arg8[%200, %c0_59, %c0_60], %203 {strides = array<i32>} : memref<8x8x32xf32, #tpu.memory_space<vmem>>, vector<1x8x32xf32>,
    %c8_i32 = arith.constant 8 : i32
    %c0_61 = arith.constant 0 : index
    %c0_62 = arith.constant 0 : index
    %c0_63 = arith.constant 0 : index
    %204 = vector.load %arg8[%c0_61, %c0_62, %c0_63] : memref<8x8x32xf32, #tpu.memory_space<vmem>>, vector<8x8x32xf32>
    %205 = vector.shape_cast %204 : vector<8x8x32xf32> to vector<64x32xf32>
    %c0_64 = arith.constant 0 : index
    %c0_65 = arith.constant 0 : index
    %206 = vector.load %arg4[%c0_64, %c0_65] : memref<32x8xf32, #tpu.memory_space<vmem>>, vector<32x8xf32>
    %cst_66 = arith.constant dense<0.000000e+00> : vector<64x8xf32>
    %207 = tpu.matmul %205, %206, %cst_66 {dimension_numbers = #tpu.dot_dimension_numbers<[1], [0], [0], [1], [0, 0, 1, 1], [], []>} : vector<64x32xf32>, vector<32x8xf32>, vector<64x8xf32> -> vector<64x8xf32>
    %c0_67 = arith.constant 0 : index
    %c0_68 = arith.constant 0 : index
    %208 = vector.load %arg5[%c0_67, %c0_68] : memref<1x8xf32, #tpu.memory_space<vmem>>, vector<1x8xf32>
    %209 = vector.broadcast %208 : vector<1x8xf32> to vector<64x8xf32>
    %210 = arith.addf %207, %209 : vector<64x8xf32>
    %211 = vector.shape_cast %210 : vector<64x8xf32> to vector<8x8x8xf32>
    %c0_69 = arith.constant 0 : index
    %c0_70 = arith.constant 0 : index
    %c0_71 = arith.constant 0 : index
    %212 = vector.load %arg6[%c0_69, %c0_70, %c0_71] : memref<8x8x8xf32, #tpu.memory_space<vmem>>, vector<8x8x8xf32>
    tpu.vector_store %arg6[%c0_69, %c0_70, %c0_71], %211 {strides = array<i32>} : memref<8x8x8xf32, #tpu.memory_space<vmem>>, vector<8x8x8xf32>,
    return
  }
}

</mosaic_0001>

<bundles_post_ra>
// kernel: term_identification_forward.1
= control target key start
LH: loop header
LB: loop body
LE: loop exit
PB: predicated region body
PF: predicated region fallthrough
CT: control target
= control target key end

     0   :  { %vm42_vm0 = vcmask 261120   ;;  %v1546_v13 = vmov 0.0|0.0   ;;  %vm1547_vm1 = vmmov 0   ;;  %v1548_v19 = vmov 0.0   ;;  %s1549_s25 = smov 64   ;;  %s1836_s1 = inlined_call_operand.vmem [shape: f32[32,128], index: 1, kind: input, shape index: {}]   ;;  %s1837_s0 = inlined_call_operand.vmem [shape: f32[8,8,32], index: 0, kind: input, shape index: {}]   ;;  %s1838_s2 = inlined_call_operand.vmem [shape: f32[32,128], index: 2, kind: input, shape index: {}]   ;;  %s1839_s3 = inlined_call_operand.vmem [shape: f32[1,128], index: 3, kind: input, shape index: {}]   ;;  %s1840_s4 = inlined_call_operand.vmem [shape: f32[32,8], index: 4, kind: input, shape index: {}]   ;;  %s1841_s5 = inlined_call_operand.vmem [shape: f32[1,8], index: 5, kind: input, shape index: {}]   ;;  %s1842_s6 = inlined_call_operand.vmem [shape: f32[8,8,8], index: 6, kind: output, shape index: {}]  }
   0x1   :  { %v31_v0 = vld [vmem:[%s1836_s1] sm:$0xff]  ;;  %v32_v1 = vld [vmem:[%s1836_s1 + $0x8] sm:$0xff]  ;;  %v33_v2 = vld [vmem:[%s1836_s1 + $0x10] sm:$0xff]  ;;  %vm1171_vm2 = vcmask 64512  }
   0x2   :  { %v1409_v3 = vpack.c.bf16 %v32_v1, %v31_v0  ;;  %v34_v4 = vld [vmem:[%s1836_s1 + $0x18] sm:$0xff]  ;;  %v27_v5 = vld [vmem:[%s1837_s0 + $0x20] sm:$0xff]  ;;  %v181_v9 = vld [vmem:[%s1838_s2 + $0x8] sm:$0xff] }
   0x3   :  { %v1413_v6 = vpack.c.bf16 %v34_v4, %v33_v2  ;;  %1295 = vmatprep.mubr.msk.f32.mxu1 %vm42_vm0, %v27_v5  ;;  %v23_v7 = vld [vmem:[%s1837_s0] sm:$0xff]  ;;  %v28_v10 = vld [vmem:[%s1837_s0 + $0x28] sm:$0xff]  ;;  %v29_v14 = vld [vmem:[%s1837_s0 + $0x30] sm:$0xff] }
   0x4   :  { %1473 = vmatprep.subr.bf16.mxu1 %v1409_v3  ;;  %1410 = vmatprep.subr.bf16.mxu0 %v1409_v3  ;;  %v180_v8 = vld [vmem:[%s1838_s2] sm:$0xff]  ;;  %v24_v12 = vld [vmem:[%s1837_s0 + $0x8] sm:$0xff]  ;;  %v182_v15 = vld [vmem:[%s1838_s2 + $0x10] sm:$0xff] }
   0x5   :  { %1475 = vmatpush3.bf16.msra.mxu1 %v1409_v3  ;;  %1412 = vmatpush3.bf16.msra.mxu0 %v1409_v3  ;;  %v1615_v11 = vpack.c.bf16 %v181_v9, %v180_v8  ;;  %v183_v16 = vld [vmem:[%s1838_s2 + $0x18] sm:$0xff]  ;;  %v1664_v24 = vld [vmem:[%s1839_s3] ss:$0 sm:$0xff]  ;;  %s1550_s3 = smov 32   ;;  %v25_v59 = vld [vmem:[%s1837_s0 + $0x10] sm:$0xff] }
   0x6   :  { %1474 = vmatprep.subr.bf16.mxu1 %v1413_v6  ;;  %1414 = vmatprep.subr.bf16.mxu0 %v1413_v6  ;;  %v30_v17 = vld [vmem:[%s1837_s0 + $0x38] sm:$0xff]  ;;  %v1638_v18 = vpack.c.bf16 %v183_v16, %v182_v15 }
   0x7   :  { %1289 = vmatprep.mubr.msk.f32.mxu0 %vm42_vm0, %v23_v7  ;;  %v26_v60 = vld [vmem:[%s1837_s0 + $0x18] sm:$0xff] }
   0x9   :  { %1476 = vmatpush3.bf16.msra.mxu1 %v1413_v6  ;;  %1416 = vmatpush3.bf16.msra.mxu0 %v1413_v6 }
   0xa   :  { %1417 = vmatprep.subr.bf16.mxu1 %v1546_v13  ;;  %1429 = vmatprep.subr.bf16.mxu0 %v1546_v13 }
   0xc   :  { %1296 = vmatmul.mubr.msk.f32.vlgmr.msra.gmra.mrb[0].mxu1 %vm42_vm0, %v28_v10  ;;  %1290 = vmatmul.mubr.msk.f32.vlgmr.msra.gmra.mrb[0].mxu0 %vm42_vm0, %v24_v12 }
   0xd   :  { %1419 = vmatpush3.bf16.msra.mxu1 %v1615_v11  ;;  %1298 = vmatprep.mubr.msk.f32.mxu1 %vm42_vm0, %v29_v14 }
   0xe   :  { %1420 = vmatprep.subr.bf16.mxu1 %v1546_v13  ;;  %1431 = vmatpush3.bf16.msra.mxu0 %v1615_v11 }
   0xf   :  { %1432 = vmatprep.subr.bf16.mxu0 %v1546_v13  ;;  %1292 = vmatprep.mubr.msk.f32.mxu0 %vm42_vm0, %v25_v59 }
  0x10   :  { %1299 = vmatmul.mubr.msk.f32.gmra.mrb[2].mxu1 %vm42_vm0, %v30_v17  ;;  %1293 = vmatmul.mubr.msk.f32.gmra.mrb[2].mxu0 %vm42_vm0, %v26_v60 }
  0x11   :  { %1422 = vmatpush3.bf16.msra.mxu1 %v1638_v18  ;;  %1309 = vmatprep.mubr.msk.f32.mxu1 %vm1547_vm1, %v1548_v19 }
  0x12   :  { %1423 = vmatprep.subr.bf16.mxu1 %v1546_v13  ;;  %1434 = vmatpush3.bf16.msra.mxu0 %v1638_v18 }
  0x13   :  { %1441 = vmatprep.subr.bf16.mxu0 %v1546_v13  ;;  %1331 = vmatprep.mubr.msk.f32.mxu0 %vm1547_vm1, %v1548_v19 }
  0x14   :  { %1310 = vmatmul.mubr.f32.vlgmr.msra.gmra.mrb[4].mxu1 %v1548_v19 }
  0x15   :  { %1425 = vmatpush3.bf16.msra.mxu1 %v1615_v11  ;;  %1320 = vmatprep.mubr.msk.f32.mxu1 %vm1547_vm1, %v1548_v19 }
  0x16   :  { %1426 = vmatprep.subr.bf16.mxu1 %v1546_v13 }
  0x19   :  { %1428 = vmatpush3.bf16.msra.mxu1 %v1638_v18 }
  0x1a   :  { %1435 = vmatprep.subr.bf16.mxu1 %v1546_v13 }
  0xdf   :  { %v1657_v20 = vpop.f32.mrb[0].mxu1  ;;  %v1291_v21 = vpop.f32.mrb[0].mxu0 }
  0xe0   :  { %v1659_v22 = vpop.f32.mrb[1].mxu1  ;;  %v133_v23 = vpop.f32.mrb[1].mxu0  ;;  %v139_v45 = vadd.f32 %v1291_v21, %v1664_v24 }
  0xe1   :  { %v134_v27 = vadd.f32 %v1664_v24, %v133_v23 }
  0xe3   :  { %v1666_v25 = vpop.f32.mrb[2].mxu1  ;;  %v1294_v0 = vpop.f32.mrb[2].mxu0 }
  0xe4   :  { %v1668_v26 = vpop.f32.mrb[3].mxu1  ;;  %v143_v1 = vpop.f32.mrb[3].mxu0 }
  0xe5   :  { %v144_v3 = vadd.f32 %v1664_v24, %v143_v1  ;;  %v159_v1 = vadd.f32 %v1657_v20, %v1664_v24 }
  0xe7   :  { %v254_v28 = vpop.f32.mrb[4].mxu1 }
  0xe8   :  { %v258_v29 = vadd.f32 %v254_v28, %v134_v27  ;;  %v1311_v30 = vpop.f32.mrb[5].mxu1 }
  0xe9   :  { %v149_v30 = vadd.f32 %v1294_v0, %v1664_v24 }
  0xea   :  { %1482 = vtanh.f32 %v258_v29  ;;  %v1193_v32 = vmul.f32 -1.442695, %v258_v29 }
  0xec   :  { %1484 = vpow2.f32 %v1193_v32 }
  0xf4   :  { %v1483_v31 = vpop.eup %1482 }
  0xf5   :  { %268 = vrot.lane.b32.xlu0 %v1483_v31, %s1549_s25 }
  0xf6   :  { %v1485_v33 = vpop.eup %1484 }
  0xf7   :  { %v262_v34 = vadd.f32 1.0, %v1485_v33 }
  0xf9   :  { %1486 = vrcp.f32 %v262_v34 }
 0x103   :  { %v1487_v35 = vpop.eup %1486 }
 0x104   :  { %v266_v38 = vmul.f32 0.0, %v1487_v35 }
 0x167   :  { %v269_v36 = vpop.permute.xlu0 %268 }
 0x168   :  { %v271_v37 = vmul.f32 %v1487_v35, %v269_v36 }
 0x16a   :  { %273 = vrot.lane.b32.xlu0 %v271_v37, %s1550_s3 }
 0x1dc   :  { %v274_v39 = vpop.permute.xlu0 %273 }
 0x1dd   :  { %v276_v40 = vadd.f32 %v274_v39, %v266_v38 }
 0x1df   :  { %1488 = vtanh.f32 %v276_v40 }
 0x1e9   :  { %v1489_v41 = vpop.eup %1488 }
 0x1ea   :  { %279 = vrot.lane.b32.xlu1 %v1489_v41, %s1549_s25 }
 0x25c   :  { %v280_v42 = vpop.permute.xlu1 %279 }
 0x25d   :  { %v282_v43 = vmul.f32 %v1487_v35, %v280_v42 }
 0x25f   :  { %284 = vrot.lane.b32.xlu1 %v282_v43, %s1550_s3 }
 0x2d1   :  { %v285_v44 = vpop.permute.xlu1 %284 }
 0x2d2   :  { %287 = vst.msk [vmem:[#allocation3] sm:$0xff] %vm42_vm0, %v285_v44  ;;  %1321 = vmatmul.mubr.msk.f32.vlgmr.msra.gmra.mrb[6].mxu1 %vm42_vm0, %v285_v44 }
 0x2d3   :  { %1437 = vmatpush3.bf16.msra.mxu1 %v1615_v11  ;;  %1342 = vmatprep.mubr.msk.f32.mxu1 %vm1547_vm1, %v1548_v19 }
 0x2d4   :  { %1438 = vmatprep.subr.bf16.mxu1 %v1546_v13 }
 0x2d7   :  { %1440 = vmatpush3.bf16.msra.mxu1 %v1638_v18 }
 0x2d8   :  { %1447 = vmatprep.subr.bf16.mxu1 %v1546_v13 }
 0x3a5   :  { %v358_v46 = vpop.f32.mrb[6].mxu1 }
 0x3a6   :  { %v362_v47 = vadd.f32 %v358_v46, %v139_v45  ;;  %v1322_v48 = vpop.f32.mrb[7].mxu1 }
 0x3a7   :  { %v154_v48 = vadd.f32 %v1664_v24, %v1659_v22 }
 0x3a8   :  { %1490 = vtanh.f32 %v362_v47  ;;  %v1195_v50 = vmul.f32 -1.442695, %v362_v47 }
 0x3aa   :  { %1492 = vpow2.f32 %v1195_v50 }
 0x3b2   :  { %v1491_v49 = vpop.eup %1490 }
 0x3b3   :  { %372 = vrot.lane.b32.xlu0 %v1491_v49, %s1549_s25 }
 0x3b4   :  { %v1493_v51 = vpop.eup %1492 }
 0x3b5   :  { %v366_v52 = vadd.f32 1.0, %v1493_v51 }
 0x3b7   :  { %1494 = vrcp.f32 %v366_v52 }
 0x3c1   :  { %v1495_v53 = vpop.eup %1494 }
 0x3c2   :  { %v370_v56 = vmul.f32 %v1495_v53, %v276_v40 }
 0x425   :  { %v373_v54 = vpop.permute.xlu0 %372 }
 0x426   :  { %v375_v55 = vmul.f32 %v1495_v53, %v373_v54 }
 0x428   :  { %377 = vrot.lane.b32.xlu1 %v375_v55, %s1550_s3 }
 0x49a   :  { %v378_v57 = vpop.permute.xlu1 %377 }
 0x49b   :  { %v380_v58 = vadd.f32 %v378_v57, %v370_v56 }
 0x49d   :  { %1496 = vtanh.f32 %v380_v58 }
 0x4a7   :  { %v1497_v61 = vpop.eup %1496 }
 0x4a8   :  { %383 = vrot.lane.b32.xlu0 %v1497_v61, %s1549_s25 }
 0x51a   :  { %v384_v62 = vpop.permute.xlu0 %383 }
 0x51b   :  { %v386_v63 = vmul.f32 %v1495_v53, %v384_v62 }
 0x51d   :  { %388 = vrot.lane.b32.xlu1 %v386_v63, %s1550_s3 }
 0x58f   :  { %v389_v2 = vpop.permute.xlu1 %388 }
 0x590   :  { %392 = vst.msk [vmem:[#allocation3 + $0x8] sm:$0xff] %vm42_vm0, %v389_v2  ;;  %1332 = vmatmul.mubr.msk.f32.vlgmr.msra.gmra.mrb[4].mxu0 %vm42_vm0, %v389_v2 }
 0x591   :  { %1443 = vmatpush3.bf16.msra.mxu0 %v1615_v11  ;;  %1353 = vmatprep.mubr.msk.f32.mxu0 %vm1547_vm1, %v1548_v19 }
 0x592   :  { %1444 = vmatprep.subr.bf16.mxu0 %v1546_v13 }
 0x595   :  { %1446 = vmatpush3.bf16.msra.mxu0 %v1638_v18 }
 0x596   :  { %1453 = vmatprep.subr.bf16.mxu0 %v1546_v13 }
 0x663   :  { %v463_v4 = vpop.f32.mrb[4].mxu0 }
 0x664   :  { %v467_v5 = vadd.f32 %v463_v4, %v144_v3  ;;  %v1333_v6 = vpop.f32.mrb[5].mxu0 }
 0x666   :  { %1498 = vtanh.f32 %v467_v5  ;;  %v1197_v8 = vmul.f32 -1.442695, %v467_v5 }
 0x668   :  { %1500 = vpow2.f32 %v1197_v8 }
 0x670   :  { %v1499_v7 = vpop.eup %1498 }
 0x671   :  { %477 = vrot.lane.b32.xlu0 %v1499_v7, %s1549_s25 }
 0x672   :  { %v1501_v9 = vpop.eup %1500 }
 0x673   :  { %v471_v10 = vadd.f32 1.0, %v1501_v9 }
 0x675   :  { %1502 = vrcp.f32 %v471_v10  ;;  %v1031_v10 = vld [vmem:[%s1840_s4] sm:$0xff] }
 0x67f   :  { %v1503_v12 = vpop.eup %1502 }
 0x680   :  { %v475_v16 = vmul.f32 %v1503_v12, %v380_v58 }
 0x6e3   :  { %v478_v14 = vpop.permute.xlu0 %477 }
 0x6e4   :  { %v480_v15 = vmul.f32 %v1503_v12, %v478_v14 }
 0x6e6   :  { %482 = vrot.lane.b32.xlu1 %v480_v15, %s1550_s3 }
 0x758   :  { %v483_v17 = vpop.permute.xlu1 %482 }
 0x759   :  { %v485_v21 = vadd.f32 %v483_v17, %v475_v16 }
 0x75b   :  { %1504 = vtanh.f32 %v485_v21 }
 0x765   :  { %v1505_v23 = vpop.eup %1504 }
 0x766   :  { %488 = vrot.lane.b32.xlu0 %v1505_v23, %s1549_s25  ;;  %v1034_v23 = vld [vmem:[%s1840_s4 + $0x18] sm:$0xff] }
 0x7d8   :  { %v489_v27 = vpop.permute.xlu0 %488 }
 0x7d9   :  { %v491_v28 = vmul.f32 %v1503_v12, %v489_v27  ;;  %v1032_v12 = vld [vmem:[%s1840_s4 + $0x8] sm:$0xff] }
 0x7da   :  { %v1465_v14 = vpack.c.bf16 %v1032_v12, %v1031_v10 }
 0x7db   :  { %493 = vrot.lane.b32.xlu1 %v491_v28, %s1550_s3 }
 0x84d   :  { %v494_v29 = vpop.permute.xlu1 %493 }
 0x84e   :  { %497 = vst.msk [vmem:[#allocation3 + $0x10] sm:$0xff] %vm42_vm0, %v494_v29  ;;  %1343 = vmatmul.mubr.msk.f32.vlgmr.msra.gmra.mrb[8].mxu1 %vm42_vm0, %v494_v29  ;;  %v1023_v29 = vld [vmem:[#allocation3] sm:$0xff] }
 0x84f   :  { %1449 = vmatpush3.bf16.msra.mxu1 %v1615_v11  ;;  %1364 = vmatprep.mubr.msk.f32.mxu1 %vm1547_vm1, %v1548_v19 }
 0x850   :  { %1450 = vmatprep.subr.bf16.mxu1 %v1546_v13 }
 0x853   :  { %1452 = vmatpush3.bf16.msra.mxu1 %v1638_v18 }
 0x854   :  { %1459 = vmatprep.subr.bf16.mxu1 %v1546_v13 }
 0x921   :  { %v568_v31 = vpop.f32.mrb[8].mxu1 }
 0x922   :  { %v572_v32 = vadd.f32 %v568_v31, %v149_v30  ;;  %v1344_v33 = vpop.f32.mrb[9].mxu1  ;;  %v1024_v30 = vld [vmem:[#allocation3 + $0x8] sm:$0xff]  ;;  %v1025_v31 = vld [vmem:[#allocation3 + $0x10] sm:$0xff] }
 0x924   :  { %1506 = vtanh.f32 %v572_v32  ;;  %v1199_v35 = vmul.f32 -1.442695, %v572_v32 }
 0x926   :  { %1508 = vpow2.f32 %v1199_v35  ;;  %v164_v35 = vadd.f32 %v1664_v24, %v1668_v26 }
 0x92e   :  { %v1507_v34 = vpop.eup %1506 }
 0x92f   :  { %582 = vrot.lane.b32.xlu0 %v1507_v34, %s1549_s25 }
 0x930   :  { %v1509_v36 = vpop.eup %1508 }
 0x931   :  { %v576_v37 = vadd.f32 1.0, %v1509_v36 }
 0x933   :  { %1510 = vrcp.f32 %v576_v37 }
 0x93d   :  { %v1511_v38 = vpop.eup %1510 }
 0x93e   :  { %v580_v41 = vmul.f32 %v1511_v38, %v485_v21  ;;  %v1033_v21 = vld [vmem:[%s1840_s4 + $0x10] sm:$0xff] }
 0x93f   :  { %v1469_v27 = vpack.c.bf16 %v1034_v23, %v1033_v21 }
 0x9a1   :  { %v583_v39 = vpop.permute.xlu0 %582 }
 0x9a2   :  { %v585_v40 = vmul.f32 %v1511_v38, %v583_v39  ;;  %v1778_v39 = vld [vmem:[%s1841_s5] ss:$0 sm:$0xff] }
 0x9a4   :  { %587 = vrot.lane.b32.xlu1 %v585_v40, %s1550_s3 }
 0xa16   :  { %v588_v42 = vpop.permute.xlu1 %587 }
 0xa17   :  { %v590_v43 = vadd.f32 %v588_v42, %v580_v41 }
 0xa19   :  { %1512 = vtanh.f32 %v590_v43 }
 0xa23   :  { %v1513_v44 = vpop.eup %1512 }
 0xa24   :  { %593 = vrot.lane.b32.xlu0 %v1513_v44, %s1549_s25 }
 0xa96   :  { %v594_v45 = vpop.permute.xlu0 %593 }
 0xa97   :  { %v596_v46 = vmul.f32 %v1511_v38, %v594_v45 }
 0xa99   :  { %598 = vrot.lane.b32.xlu1 %v596_v46, %s1550_s3 }
 0xb0b   :  { %v599_v47 = vpop.permute.xlu1 %598 }
 0xb0c   :  { %602 = vst.msk [vmem:[#allocation3 + $0x18] sm:$0xff] %vm42_vm0, %v599_v47  ;;  %1354 = vmatmul.mubr.msk.f32.vlgmr.msra.gmra.mrb[6].mxu0 %vm42_vm0, %v599_v47 }
 0xb0d   :  { %1455 = vmatpush3.bf16.msra.mxu0 %v1615_v11  ;;  %1375 = vmatprep.mubr.msk.f32.mxu0 %vm1547_vm1, %v1548_v19 }
 0xb0e   :  { %1456 = vmatprep.subr.bf16.mxu0 %v1546_v13 }
 0xb11   :  { %1458 = vmatpush3.bf16.msra.mxu0 %v1638_v18 }
 0xb12   :  { %1466 = vmatprep.subr.bf16.mxu0 %v1465_v14 }
 0xb13   :  { %v1026_v32 = vld [vmem:[#allocation3 + $0x18] sm:$0xff] }
 0xbdf   :  { %v673_v49 = vpop.f32.mrb[6].mxu0 }
 0xbe0   :  { %v677_v50 = vadd.f32 %v673_v49, %v154_v48  ;;  %v1355_v51 = vpop.f32.mrb[7].mxu0 }
 0xbe2   :  { %1514 = vtanh.f32 %v677_v50  ;;  %v1201_v53 = vmul.f32 -1.442695, %v677_v50 }
 0xbe4   :  { %1516 = vpow2.f32 %v1201_v53 }
 0xbec   :  { %v1515_v52 = vpop.eup %1514 }
 0xbed   :  { %687 = vrot.lane.b32.xlu0 %v1515_v52, %s1549_s25 }
 0xbee   :  { %v1517_v54 = vpop.eup %1516 }
 0xbef   :  { %v681_v55 = vadd.f32 1.0, %v1517_v54 }
 0xbf1   :  { %1518 = vrcp.f32 %v681_v55 }
 0xbfb   :  { %v1519_v56 = vpop.eup %1518 }
 0xbfc   :  { %v685_v59 = vmul.f32 %v1519_v56, %v590_v43 }
 0xc5f   :  { %v688_v57 = vpop.permute.xlu0 %687 }
 0xc60   :  { %v690_v58 = vmul.f32 %v1519_v56, %v688_v57 }
 0xc62   :  { %692 = vrot.lane.b32.xlu1 %v690_v58, %s1550_s3 }
 0xcd4   :  { %v693_v60 = vpop.permute.xlu1 %692 }
 0xcd5   :  { %v695_v22 = vadd.f32 %v693_v60, %v685_v59 }
 0xcd7   :  { %1520 = vtanh.f32 %v695_v22 }
 0xce1   :  { %v1521_v61 = vpop.eup %1520 }
 0xce2   :  { %698 = vrot.lane.b32.xlu0 %v1521_v61, %s1549_s25 }
 0xd54   :  { %v699_v62 = vpop.permute.xlu0 %698 }
 0xd55   :  { %v701_v63 = vmul.f32 %v1519_v56, %v699_v62 }
 0xd57   :  { %703 = vrot.lane.b32.xlu1 %v701_v63, %s1550_s3 }
 0xdc9   :  { %v704_v0 = vpop.permute.xlu1 %703 }
 0xdca   :  { %707 = vst.msk [vmem:[#allocation3 + $0x20] sm:$0xff] %vm42_vm0, %v704_v0  ;;  %1365 = vmatmul.mubr.msk.f32.vlgmr.msra.gmra.mrb[10].mxu1 %vm42_vm0, %v704_v0 }
 0xdcb   :  { %1461 = vmatpush3.bf16.msra.mxu1 %v1615_v11  ;;  %1386 = vmatprep.mubr.msk.f32.mxu1 %vm1547_vm1, %v1548_v19 }
 0xdcc   :  { %1462 = vmatprep.subr.bf16.mxu1 %v1546_v13 }
 0xdcf   :  { %1464 = vmatpush3.bf16.msra.mxu1 %v1638_v18 }
 0xdd1   :  { %v1027_v33 = vld [vmem:[#allocation3 + $0x20] sm:$0xff] }
 0xe9d   :  { %v778_v2 = vpop.f32.mrb[10].mxu1 }
 0xe9e   :  { %v782_v3 = vadd.f32 %v778_v2, %v159_v1  ;;  %v1366_v4 = vpop.f32.mrb[11].mxu1  ;;  %v169_v1 = vadd.f32 %v1666_v25, %v1664_v24 }
 0xea0   :  { %1522 = vtanh.f32 %v782_v3  ;;  %v1203_v6 = vmul.f32 -1.442695, %v782_v3 }
 0xea2   :  { %1524 = vpow2.f32 %v1203_v6 }
 0xeaa   :  { %v1523_v5 = vpop.eup %1522 }
 0xeab   :  { %792 = vrot.lane.b32.xlu0 %v1523_v5, %s1549_s25 }
 0xeac   :  { %v1525_v11 = vpop.eup %1524 }
 0xead   :  { %v786_v7 = vadd.f32 1.0, %v1525_v11 }
 0xeaf   :  { %1526 = vrcp.f32 %v786_v7 }
 0xeb9   :  { %v1527_v19 = vpop.eup %1526 }
 0xeba   :  { %v790_v18 = vmul.f32 %v1527_v19, %v695_v22 }
 0xf1d   :  { %v793_v8 = vpop.permute.xlu0 %792 }
 0xf1e   :  { %v795_v13 = vmul.f32 %v1527_v19, %v793_v8 }
 0xf20   :  { %797 = vrot.lane.b32.xlu1 %v795_v13, %s1550_s3 }
 0xf92   :  { %v798_v9 = vpop.permute.xlu1 %797 }
 0xf93   :  { %v1748_v20 = vadd.f32 %v798_v9, %v790_v18 }
 0xf95   :  { %1528 = vtanh.f32 %v1748_v20 }
 0xf9f   :  { %v1529_v15 = vpop.eup %1528 }
 0xfa0   :  { %803 = vrot.lane.b32.xlu0 %v1529_v15, %s1549_s25 }
0x1012   :  { %v804_v16 = vpop.permute.xlu0 %803 }
0x1013   :  { %v806_v17 = vmul.f32 %v1527_v19, %v804_v16 }
0x1015   :  { %808 = vrot.lane.b32.xlu1 %v806_v17, %s1550_s3 }
0x1087   :  { %v809_v28 = vpop.permute.xlu1 %808 }
0x1088   :  { %812 = vst.msk [vmem:[#allocation3 + $0x28] sm:$0xff] %vm42_vm0, %v809_v28  ;;  %1376 = vmatmul.mubr.msk.f32.vlgmr.msra.gmra.mrb[8].mxu0 %vm42_vm0, %v809_v28 }
0x1089   :  { %1468 = vmatpush3.bf16.msra.mxu0 %v1465_v14  ;;  %1397 = vmatprep.mubr.msk.f32.mxu0 %vm42_vm0, %v1023_v29 }
0x108a   :  { %1470 = vmatprep.subr.bf16.mxu0 %v1469_v27 }
0x108d   :  { %1472 = vmatpush3.bf16.msra.mxu0 %v1469_v27 }
0x108f   :  { %v1028_v34 = vld [vmem:[#allocation3 + $0x28] sm:$0xff] }
0x1090   :  { %1398 = vmatmul.mubr.msk.f32.vlgmr.msra.gmra.mrb[10].mxu0 %vm42_vm0, %v1024_v30 }
0x1091   :  { %1400 = vmatprep.mubr.msk.f32.mxu0 %vm42_vm0, %v1025_v31 }
0x1094   :  { %1401 = vmatmul.mubr.msk.f32.gmra.mrb[12].mxu0 %vm42_vm0, %v1026_v32 }
0x1095   :  { %1403 = vmatprep.mubr.msk.f32.mxu0 %vm42_vm0, %v1027_v33 }
0x1098   :  { %1404 = vmatmul.mubr.msk.f32.gmra.mrb[14].mxu0 %vm42_vm0, %v1028_v34 }
0x115b   :  { %v883_v36 = vpop.f32.mrb[8].mxu0 }
0x115c   :  { %v887_v37 = vadd.f32 %v883_v36, %v164_v35  ;;  %v1377_v38 = vpop.f32.mrb[9].mxu0 }
0x115e   :  { %1530 = vtanh.f32 %v887_v37  ;;  %v1205_v52 = vmul.f32 -1.442695, %v887_v37 }
0x1160   :  { %1532 = vpow2.f32 %v1205_v52 }
0x1163   :  { %v1399_v40 = vpop.f32.mrb[10].mxu0 }
0x1164   :  { %v1138_v41 = vadd.f32 %v1399_v40, %v1778_v39  ;;  %v1132_v42 = vpop.f32.mrb[11].mxu0 }
0x1165   :  { %v1133_v43 = vadd.f32 %v1778_v39, %v1132_v42 }
0x1166   :  { %1173 = vst.msk [vmem:[%s1842_s6 + $0x8] sm:$0xff] %vm1171_vm2, %v1138_v41 }
0x1167   :  { %1172 = vst.msk [vmem:[%s1842_s6] sm:$0xff] %vm1171_vm2, %v1133_v43  ;;  %v1402_v26 = vpop.f32.mrb[12].mxu0 }
0x1168   :  { %v1531_v44 = vpop.eup %1530  ;;  %v1148_v45 = vadd.f32 %v1402_v26, %v1778_v39  ;;  %v1142_v46 = vpop.f32.mrb[13].mxu0 }
0x1169   :  { %v1143_v47 = vadd.f32 %v1778_v39, %v1142_v46  ;;  %897 = vrot.lane.b32.xlu0 %v1531_v44, %s1549_s25 }
0x116a   :  { %1175 = vst.msk [vmem:[%s1842_s6 + $0x18] sm:$0xff] %vm1171_vm2, %v1148_v45  ;;  %v1533_v53 = vpop.eup %1532 }
0x116b   :  { %1174 = vst.msk [vmem:[%s1842_s6 + $0x10] sm:$0xff] %vm1171_vm2, %v1143_v47  ;;  %v1405_v48 = vpop.f32.mrb[14].mxu0  ;;  %v891_v54 = vadd.f32 1.0, %v1533_v53 }
0x116c   :  { %v1158_v49 = vadd.f32 %v1405_v48, %v1778_v39  ;;  %v1152_v50 = vpop.f32.mrb[15].mxu0 }
0x116d   :  { %v1153_v51 = vadd.f32 %v1778_v39, %v1152_v50  ;;  %1534 = vrcp.f32 %v891_v54 }
0x116e   :  { %1177 = vst.msk [vmem:[%s1842_s6 + $0x28] sm:$0xff] %vm1171_vm2, %v1158_v49 }
0x116f   :  { %1176 = vst.msk [vmem:[%s1842_s6 + $0x20] sm:$0xff] %vm1171_vm2, %v1153_v51 }
0x1177   :  { %v1535_v55 = vpop.eup %1534 }
0x1178   :  { %v895_v58 = vmul.f32 %v1535_v55, %v1748_v20 }
0x11db   :  { %v898_v56 = vpop.permute.xlu0 %897 }
0x11dc   :  { %v900_v57 = vmul.f32 %v1535_v55, %v898_v56 }
0x11de   :  { %902 = vrot.lane.b32.xlu1 %v900_v57, %s1550_s3 }
0x1250   :  { %v903_v59 = vpop.permute.xlu1 %902 }
0x1251   :  { %v905_v60 = vadd.f32 %v903_v59, %v895_v58 }
0x1253   :  { %1536 = vtanh.f32 %v905_v60 }
0x125d   :  { %v1537_v22 = vpop.eup %1536 }
0x125e   :  { %908 = vrot.lane.b32.xlu0 %v1537_v22, %s1549_s25 }
0x12d0   :  { %v909_v61 = vpop.permute.xlu0 %908 }
0x12d1   :  { %v911_v62 = vmul.f32 %v1535_v55, %v909_v61 }
0x12d3   :  { %913 = vrot.lane.b32.xlu1 %v911_v62, %s1550_s3 }
0x1345   :  { %v914_v63 = vpop.permute.xlu1 %913 }
0x1346   :  { %917 = vst.msk [vmem:[#allocation3 + $0x30] sm:$0xff] %vm42_vm0, %v914_v63  ;;  %1387 = vmatmul.mubr.msk.f32.vlgmr.msra.gmra.mrb[12].mxu1 %vm42_vm0, %v914_v63 }
0x134d   :  { %v1029_v0 = vld [vmem:[#allocation3 + $0x30] sm:$0xff] }
0x134e   :  { %1406 = vmatprep.mubr.msk.f32.mxu0 %vm42_vm0, %v1029_v0 }
0x1419   :  { %v988_v2 = vpop.f32.mrb[12].mxu1 }
0x141a   :  { %v992_v3 = vadd.f32 %v988_v2, %v169_v1  ;;  %v1388_v4 = vpop.f32.mrb[13].mxu1 }
0x141c   :  { %1538 = vtanh.f32 %v992_v3  ;;  %v1207_v6 = vmul.f32 -1.442695, %v992_v3 }
0x141e   :  { %1540 = vpow2.f32 %v1207_v6 }
0x1426   :  { %v1539_v5 = vpop.eup %1538 }
0x1427   :  { %1002 = vrot.lane.b32.xlu0 %v1539_v5, %s1549_s25 }
0x1428   :  { %v1541_v11 = vpop.eup %1540 }
0x1429   :  { %v996_v7 = vadd.f32 1.0, %v1541_v11 }
0x142b   :  { %1542 = vrcp.f32 %v996_v7 }
0x1435   :  { %v1543_v19 = vpop.eup %1542 }
0x1436   :  { %v1000_v18 = vmul.f32 %v1543_v19, %v905_v60 }
0x1499   :  { %v1003_v8 = vpop.permute.xlu0 %1002 }
0x149a   :  { %v1005_v13 = vmul.f32 %v1543_v19, %v1003_v8 }
0x149c   :  { %1007 = vrot.lane.b32.xlu1 %v1005_v13, %s1550_s3 }
0x150e   :  { %v1008_v9 = vpop.permute.xlu1 %1007 }
0x150f   :  { %v1010_v24 = vadd.f32 %v1008_v9, %v1000_v18 }
0x1511   :  { %1544 = vtanh.f32 %v1010_v24 }
0x151b   :  { %v1545_v25 = vpop.eup %1544 }
0x151c   :  { %1013 = vrot.lane.b32.xlu0 %v1545_v25, %s1549_s25 }
0x158e   :  { %v1014_v20 = vpop.permute.xlu0 %1013 }
0x158f   :  { %v1016_v10 = vmul.f32 %v1543_v19, %v1014_v20 }
0x1591   :  { %1018 = vrot.lane.b32.xlu1 %v1016_v10, %s1550_s3 }
0x1603   :  { %v1019_v12 = vpop.permute.xlu1 %1018 }
0x1604   :  { %1022 = vst.msk [vmem:[#allocation3 + $0x38] sm:$0xff] %vm42_vm0, %v1019_v12 }
0x160b   :  { %v1030_v14 = vld [vmem:[#allocation3 + $0x38] sm:$0xff] }
0x160c   :  { %1407 = vmatmul.mubr.msk.f32.gmra.mrb[16].mxu0 %vm42_vm0, %v1030_v14 }
0x16df   :  { %v1408_v15 = vpop.f32.mrb[16].mxu0 }
0x16e0   :  { %v1168_v16 = vadd.f32 %v1408_v15, %v1778_v39  ;;  %v1162_v17 = vpop.f32.mrb[17].mxu0 }
0x16e1   :  { %v1163_v21 = vadd.f32 %v1778_v39, %v1162_v17 }
0x16e2   :  { %1179 = vst.msk [vmem:[%s1842_s6 + $0x38] sm:$0xff] %vm1171_vm2, %v1168_v16 }
0x16e3   :  { %1178 = vst.msk [vmem:[%s1842_s6 + $0x30] sm:$0xff] %vm1171_vm2, %v1163_v21 }

</bundles_post_ra>
